<compile_context>
chip_gen: v7x
topology: tpu7x:2x2x1
jax: 0.10.0
libtpu: 0.0.40
codegen_flags: <defaults>
</compile_context>

<pallas_src>
import functools

import jax
import jax.numpy as jnp
from jax import lax
from jax.experimental import pallas as pl
from jax.experimental.pallas import tpu as pltpu


# ----------------------- fused conv + BN + ReLU kernel ------------------------
def _residual_node_kernel(patches_ref, w_ref, g_ref, b_ref, o_ref, *, eps):
    # patches_ref: (N, KK, M)  f32 im2col patches, lane-dense (M = Ho*Wo on lanes)
    # w_ref      : (Cout, KK)  f32 flattened conv weight (OIHW flatten order)
    # g_ref      : (Cout, 1)   gamma
    # b_ref      : (Cout, 1)   beta
    # o_ref      : (N, Cout, M) conv->BN->ReLU output, lane-dense
    N, KK, M = patches_ref.shape
    Cout = w_ref.shape[0]
    inv_count = 1.0 / float(N * M)

    w = w_ref[...]                                   # (Cout, KK)

    # Pass 1: conv as a single MXU matmul per image; keep every conv output
    # resident on-chip (no HBM round trip before BatchNorm). Accumulate the
    # per-channel sum for the batch mean on the fly.
    ys = []
    ch_sum = jnp.zeros((Cout, 1), jnp.float32)
    for n in range(N):                               # N is small & static
        y = jnp.dot(w, patches_ref[n],
                    preferred_element_type=jnp.float32)   # (Cout, M)
        ys.append(y)
        ch_sum = ch_sum + jnp.sum(y, axis=1, keepdims=True)
    mean = ch_sum * inv_count                        # (Cout, 1)

    # Pass 2 (still in VMEM/vregs): centered variance — numerically safe,
    # avoids the E[x^2] - E[x]^2 cancellation of the one-pass form.
    ch_sq = jnp.zeros((Cout, 1), jnp.float32)
    for n in range(N):
        d = ys[n] - mean
        ch_sq = ch_sq + jnp.sum(d * d, axis=1, keepdims=True)
    var = ch_sq * inv_count                          # biased variance

    # BN finalize, computed exactly once.
    scale = g_ref[...] * lax.rsqrt(var + eps)        # (Cout, 1)
    shift = b_ref[...] - mean * scale

    # Pass 3: normalize + ReLU, lane-dense unmasked stores.
    for n in range(N):
        o_ref[n] = jnp.maximum(ys[n] * scale + shift, 0.0)


# ------------------------------------ wrapper ---------------------------------
def residual_node_forward(x_nchw, params, *, kernel_size=3, stride=1,
                          padding=1, eps=1e-5):
    N, Cin, H, W = x_nchw.shape
    k, s, p = kernel_size, stride, padding
    Cout = params["weight"].shape[0]
    Ho = (H + 2 * p - k) // s + 1
    Wo = (W + 2 * p - k) // s + 1
    M = Ho * Wo
    KK = Cin * k * k

    # Layout glue (pure data movement; all MACs happen inside the kernel).
    # im2col patch slab: rows ordered as (Cin, k, k) to match OIHW weight flatten.
    x = x_nchw.astype(jnp.float32)
    x_pad = jnp.pad(x, ((0, 0), (0, 0), (p, p), (p, p)))
    taps = []
    for di in range(k):
        for dj in range(k):
            taps.append(x_pad[:, :, di:di + s * (Ho - 1) + 1:s,
                              dj:dj + s * (Wo - 1) + 1:s])   # (N, Cin, Ho, Wo)
    patches = jnp.stack(taps, axis=2)                         # (N, Cin, k*k, Ho, Wo)
    patches = patches.reshape(N, KK, M)                       # lane-dense RHS

    w2d = params["weight"].reshape(Cout, KK).astype(jnp.float32)
    gamma = params["gamma"].reshape(Cout, 1).astype(jnp.float32)
    beta = params["beta"].reshape(Cout, 1).astype(jnp.float32)

    vmem = pl.BlockSpec(memory_space=pltpu.MemorySpace.VMEM)
    out_flat = pl.pallas_call(
        functools.partial(_residual_node_kernel, eps=eps),
        out_shape=jax.ShapeDtypeStruct((N, Cout, M), jnp.float32),
        in_specs=[vmem, vmem, vmem, vmem],
        out_specs=vmem,
    )(patches, w2d, gamma, beta)

    # (N, Cout, Ho*Wo) -> NCHW is a free metadata reshape.
    return out_flat.reshape(N, Cout, Ho, Wo)


# ----------------------- pure-JAX reference (for checking) --------------------
def residual_node_reference(x, params, *, kernel_size=3, stride=1, padding=1,
                            eps=1e-5):
    dn = ("NCHW", "OIHW", "NCHW")
    y = lax.conv_general_dilated(x, params["weight"], (stride, stride),
                                 [(padding, padding)] * 2,
                                 dimension_numbers=dn)
    mean = y.mean(axis=(0, 2, 3), keepdims=True)
    var = ((y - mean) ** 2).mean(axis=(0, 2, 3), keepdims=True)
    y = (y - mean) / jnp.sqrt(var + eps) * params["gamma"].reshape(1, -1, 1, 1) \
        + params["beta"].reshape(1, -1, 1, 1)
    return jax.nn.relu(y)


if __name__ == "__main__":
    # ResidualNode(in_channels=4, out_channels=8, stride=1, kernel_size=3,
    #              padding=1, bias=False)
    N, Cin, Cout, H, W = 2, 4, 8, 16, 16
    k, s, p = 3, 1, 1

    key = jax.random.PRNGKey(0)
    k0, k1 = jax.random.split(key, 2)
    params = {
        "weight": 0.2 * jax.random.normal(k0, (Cout, Cin, k, k), jnp.float32),
        "gamma": jnp.ones((Cout,), jnp.float32),
        "beta": jnp.zeros((Cout,), jnp.float32),
    }
    x = jax.random.normal(k1, (N, Cin, H, W), jnp.float32)

    out = residual_node_forward(x, params, kernel_size=k, stride=s, padding=p)
    out = jax.block_until_ready(out)

    ref = residual_node_reference(x, params, kernel_size=k, stride=s, padding=p)
    assert out.shape == (N, Cout, H, W), out.shape
    assert jnp.allclose(out, ref, rtol=1e-3, atol=1e-3), \
        float(jnp.max(jnp.abs(out - ref)))

    print("KERNEL_OK")
</pallas_src>

<mosaic_0001>
module attributes {stable_mosaic.version = 11 : i64} {
  func.func @_residual_node_kernel(%arg0: memref<2x36x256xf32, #tpu.memory_space<vmem>>, %arg1: memref<8x36xf32, #tpu.memory_space<vmem>>, %arg2: memref<8x1xf32, #tpu.memory_space<vmem>>, %arg3: memref<8x1xf32, #tpu.memory_space<vmem>>, %arg4: memref<2x8x256xf32, #tpu.memory_space<vmem>>) attributes {dimension_semantics = [], scalar_prefetch = 0 : i64, scratch_operands = 0 : i64, tpu.core_type = #tpu.core_type<tc>} {
    %c0 = arith.constant 0 : index
    %c0_0 = arith.constant 0 : index
    %0 = vector.load %arg1[%c0, %c0_0] : memref<8x36xf32, #tpu.memory_space<vmem>>, vector<8x36xf32>
    %cst = arith.constant 0.000000e+00 : f32
    %1 = vector.broadcast %cst : f32 to vector<8x1xf32>
    %c0_1 = arith.constant 0 : index
    %c0_2 = arith.constant 0 : index
    %c0_3 = arith.constant 0 : index
    %2 = vector.load %arg0[%c0_1, %c0_2, %c0_3] : memref<2x36x256xf32, #tpu.memory_space<vmem>>, vector<1x36x256xf32>
    %3 = vector.shape_cast %2 : vector<1x36x256xf32> to vector<36x256xf32>
    %cst_4 = arith.constant dense<0.000000e+00> : vector<8x256xf32>
    %4 = tpu.matmul %0, %3, %cst_4 {dimension_numbers = #tpu.dot_dimension_numbers<[1], [0], [0], [1], [0, 0, 1, 1], [], []>} : vector<8x36xf32>, vector<36x256xf32>, vector<8x256xf32> -> vector<8x256xf32>
    %cst_5 = arith.constant dense<0.000000e+00> : vector<8xf32>
    %5 = vector.multi_reduction <add>, %4, %cst_5 [1] : vector<8x256xf32> to vector<8xf32>
    %6 = vector.shape_cast %5 : vector<8xf32> to vector<8x1xf32>
    %7 = arith.addf %1, %6 : vector<8x1xf32>
    %c1 = arith.constant 1 : index
    %c0_6 = arith.constant 0 : index
    %c0_7 = arith.constant 0 : index
    %8 = vector.load %arg0[%c1, %c0_6, %c0_7] : memref<2x36x256xf32, #tpu.memory_space<vmem>>, vector<1x36x256xf32>
    %9 = vector.shape_cast %8 : vector<1x36x256xf32> to vector<36x256xf32>
    %cst_8 = arith.constant dense<0.000000e+00> : vector<8x256xf32>
    %10 = tpu.matmul %0, %9, %cst_8 {dimension_numbers = #tpu.dot_dimension_numbers<[1], [0], [0], [1], [0, 0, 1, 1], [], []>} : vector<8x36xf32>, vector<36x256xf32>, vector<8x256xf32> -> vector<8x256xf32>
    %cst_9 = arith.constant dense<0.000000e+00> : vector<8xf32>
    %11 = vector.multi_reduction <add>, %10, %cst_9 [1] : vector<8x256xf32> to vector<8xf32>
    %12 = vector.shape_cast %11 : vector<8xf32> to vector<8x1xf32>
    %13 = arith.addf %7, %12 : vector<8x1xf32>
    %cst_10 = arith.constant 0.001953125 : f32
    %14 = vector.broadcast %cst_10 : f32 to vector<8x1xf32>
    %15 = arith.mulf %13, %14 : vector<8x1xf32>
    %cst_11 = arith.constant 0.000000e+00 : f32
    %16 = vector.broadcast %cst_11 : f32 to vector<8x1xf32>
    %17 = vector.broadcast %15 : vector<8x1xf32> to vector<8x256xf32>
    %18 = arith.subf %4, %17 : vector<8x256xf32>
    %19 = arith.mulf %18, %18 : vector<8x256xf32>
    %cst_12 = arith.constant dense<0.000000e+00> : vector<8xf32>
    %20 = vector.multi_reduction <add>, %19, %cst_12 [1] : vector<8x256xf32> to vector<8xf32>
    %21 = vector.shape_cast %20 : vector<8xf32> to vector<8x1xf32>
    %22 = arith.addf %16, %21 : vector<8x1xf32>
    %23 = vector.broadcast %15 : vector<8x1xf32> to vector<8x256xf32>
    %24 = arith.subf %10, %23 : vector<8x256xf32>
    %25 = arith.mulf %24, %24 : vector<8x256xf32>
    %cst_13 = arith.constant dense<0.000000e+00> : vector<8xf32>
    %26 = vector.multi_reduction <add>, %25, %cst_13 [1] : vector<8x256xf32> to vector<8xf32>
    %27 = vector.shape_cast %26 : vector<8xf32> to vector<8x1xf32>
    %28 = arith.addf %22, %27 : vector<8x1xf32>
    %cst_14 = arith.constant 0.001953125 : f32
    %29 = vector.broadcast %cst_14 : f32 to vector<8x1xf32>
    %30 = arith.mulf %28, %29 : vector<8x1xf32>
    %c0_15 = arith.constant 0 : index
    %c0_16 = arith.constant 0 : index
    %31 = vector.load %arg2[%c0_15, %c0_16] : memref<8x1xf32, #tpu.memory_space<vmem>>, vector<8x1xf32>
    %cst_17 = arith.constant 9.99999974E-6 : f32
    %32 = vector.broadcast %cst_17 : f32 to vector<8x1xf32>
    %33 = arith.addf %30, %32 : vector<8x1xf32>
    %34 = math.rsqrt %33 : vector<8x1xf32>
    %35 = arith.mulf %31, %34 : vector<8x1xf32>
    %c0_18 = arith.constant 0 : index
    %c0_19 = arith.constant 0 : index
    %36 = vector.load %arg3[%c0_18, %c0_19] : memref<8x1xf32, #tpu.memory_space<vmem>>, vector<8x1xf32>
    %37 = arith.mulf %15, %35 : vector<8x1xf32>
    %38 = arith.subf %36, %37 : vector<8x1xf32>
    %39 = vector.broadcast %35 : vector<8x1xf32> to vector<8x256xf32>
    %40 = arith.mulf %4, %39 : vector<8x256xf32>
    %41 = vector.broadcast %38 : vector<8x1xf32> to vector<8x256xf32>
    %42 = arith.addf %40, %41 : vector<8x256xf32>
    %cst_20 = arith.constant 0.000000e+00 : f32
    %43 = vector.broadcast %cst_20 : f32 to vector<8x256xf32>
    %44 = arith.maximumf %42, %43 : vector<8x256xf32>
    %c0_21 = arith.constant 0 : index
    %c0_22 = arith.constant 0 : index
    %c0_23 = arith.constant 0 : index
    %45 = vector.load %arg4[%c0_21, %c0_22, %c0_23] : memref<2x8x256xf32, #tpu.memory_space<vmem>>, vector<1x8x256xf32>
    %46 = vector.shape_cast %45 : vector<1x8x256xf32> to vector<8x256xf32>
    %47 = vector.shape_cast %44 : vector<8x256xf32> to vector<1x8x256xf32>
    tpu.vector_store %arg4[%c0_21, %c0_22, %c0_23], %47 {strides = array<i32>} : memref<2x8x256xf32, #tpu.memory_space<vmem>>, vector<1x8x256xf32>,
    %48 = vector.broadcast %35 : vector<8x1xf32> to vector<8x256xf32>
    %49 = arith.mulf %10, %48 : vector<8x256xf32>
    %50 = vector.broadcast %38 : vector<8x1xf32> to vector<8x256xf32>
    %51 = arith.addf %49, %50 : vector<8x256xf32>
    %cst_24 = arith.constant 0.000000e+00 : f32
    %52 = vector.broadcast %cst_24 : f32 to vector<8x256xf32>
    %53 = arith.maximumf %51, %52 : vector<8x256xf32>
    %c1_25 = arith.constant 1 : index
    %c0_26 = arith.constant 0 : index
    %c0_27 = arith.constant 0 : index
    %54 = vector.load %arg4[%c1_25, %c0_26, %c0_27] : memref<2x8x256xf32, #tpu.memory_space<vmem>>, vector<1x8x256xf32>
    %55 = vector.shape_cast %54 : vector<1x8x256xf32> to vector<8x256xf32>
    %56 = vector.shape_cast %53 : vector<8x256xf32> to vector<1x8x256xf32>
    tpu.vector_store %arg4[%c1_25, %c0_26, %c0_27], %56 {strides = array<i32>} : memref<2x8x256xf32, #tpu.memory_space<vmem>>, vector<1x8x256xf32>,
    return
  }
}

</mosaic_0001>

<bundles_post_ra>
// kernel: tpu_custom_call.1
= control target key start
LH: loop header
LB: loop body
LE: loop exit
PB: predicated region body
PF: predicated region fallthrough
CT: control target
= control target key end

     0   :  { %v340_v7 = vmov 0.0   ;;  %vm33_vm0 = vcmask 1043456   ;;  %s451_s0 = inlined_call_operand.vmem [shape: f32[2,36,256], index: 0, kind: input, shape index: {}]   ;;  %s452_s1 = inlined_call_operand.vmem [shape: f32[8,36], index: 1, kind: input, shape index: {}]   ;;  %s453_s2 = inlined_call_operand.vmem [shape: f32[8,1], index: 2, kind: input, shape index: {}]   ;;  %s454_s3 = inlined_call_operand.vmem [shape: f32[8,1], index: 3, kind: input, shape index: {}]   ;;  %s455_s4 = inlined_call_operand.hbm [shape: f32[2,8,256], index: 4, kind: output, shape index: {}]  }
   0x1   :  { %v20_v0 = vld [vmem:[%s451_s0 + $0x8] sm:$0xff]  ;;  %v22_v1 = vld [vmem:[%s451_s0 + $0x18] sm:$0xff]  ;;  %v19_v2 = vld [vmem:[%s451_s0] sm:$0xff]  ;;  %104 = vmatprep.mubr.f32.mxu0 %v340_v7  ;;  %196 = vmatprep.mubr.f32.mxu1 %v340_v7 }
   0x2   :  { %v291_v3 = vpack.c.bf16 %v22_v1, %v20_v0  ;;  %v21_v4 = vld [vmem:[%s451_s0 + $0x10] sm:$0xff]  ;;  %v279_v5 = vld [vmem:[%s451_s0 + $0x58] sm:$0xff]  ;;  %v281_v6 = vld [vmem:[%s451_s0 + $0x68] sm:$0xff] }
   0x3   :  { %v293_v8 = vpack.c.bf16 %v21_v4, %v19_v2  ;;  %v299_v9 = vpack.c.bf16 %v281_v6, %v279_v5  ;;  %v24_v10 = vld [vmem:[%s451_s0 + $0x28] sm:$0xff]  ;;  %v26_v11 = vld [vmem:[%s451_s0 + $0x38] sm:$0xff]  ;;  %v278_v12 = vld [vmem:[%s451_s0 + $0x50] sm:$0xff] }
   0x4   :  { %292 = vmatprep.subr.bf16.mxu0 %v291_v3  ;;  %v295_v13 = vpack.c.bf16 %v26_v11, %v24_v10  ;;  %v280_v14 = vld [vmem:[%s451_s0 + $0x60] sm:$0xff]  ;;  %v25_v16 = vld [vmem:[%s451_s0 + $0x30] sm:$0xff]  ;;  %v283_v19 = vld [vmem:[%s451_s0 + $0x78] sm:$0xff] }
   0x5   :  { %v23_v15 = vld [vmem:[%s451_s0 + $0x20] sm:$0xff]  ;;  %294 = vmatpush1.bf16.msra.mxu0 %v293_v8  ;;  %300 = vmatprep.subr.bf16.mxu1 %v299_v9  ;;  %v301_v17 = vpack.c.bf16 %v280_v14, %v278_v12  ;;  %v285_v20 = vld [vmem:[%s451_s0 + $0x88] sm:$0xff]  ;;  %v282_v22 = vld [vmem:[%s451_s0 + $0x70] sm:$0xff] }
   0x6   :  { %v297_v18 = vpack.c.bf16 %v25_v16, %v23_v15  ;;  %296 = vmatprep.subr.bf16.mxu0 %v295_v13  ;;  %v303_v21 = vpack.c.bf16 %v285_v20, %v283_v19  ;;  %v284_v23 = vld [vmem:[%s451_s0 + $0x80] sm:$0xff]  ;;  %v28_v24 = vld [vmem:[%s451_s0 + $0x48] sm:$0xf] }
   0x7   :  { %302 = vmatpush1.bf16.msra.mxu1 %v301_v17  ;;  %v305_v25 = vpack.c.bf16 %v284_v23, %v282_v22 }
   0x8   :  { %304 = vmatprep.subr.bf16.mxu1 %v303_v21 }
   0x9   :  { %9 = vsyncpa [#allocation3], 0  ;;  %298 = vmatpush1.bf16.msra.mxu0 %v297_v18  ;;  %v287_v26 = vld [vmem:[%s451_s0 + $0x98] sm:$0xf]  ;;  %v27_v27 = vld [vmem:[%s451_s0 + $0x40] sm:$0xf] }
   0xa   :  { %275 = vmatprep.subr.msk.mxu0 %vm33_vm0, %v28_v24  ;;  %v18_v28 = vld [vmem:[%s452_s1] sm:$0xff]  ;;  %vm29_vm1 = vcmask 293888   ;;  %v286_v29 = vld [vmem:[%s451_s0 + $0x90] sm:$0xf]  ;;  %v341_v50 = vmov 0   ;;  %s342_s7 = smov [#allocation2]  }
   0xb   :  { %306 = vmatpush1.bf16.msra.mxu1 %v305_v25  ;;  %312 = vset.pattern.permute.xlu0 %v341_v50  ;;  %v225_v56 = vld [vmem:[%s453_s2] sm:$0xff]  ;;  %s264_s8 = sshll.u32 %s342_s7, 4  ;;  %s265_s8 = int_to_ptr.vmem [resolvable:$true] %s264_s8 }
   0xc   :  { %288 = vmatprep.subr.msk.mxu1 %vm33_vm0, %v287_v26  ;;  %313 = vset.pattern.permute.xlu1 %v341_v50  ;;  %v229_v59 = vld [vmem:[%s454_s3] sm:$0xff]  ;;  %s316_s2 = scalar_lea.vmem %s265_s8, 512  ;;  %p321_p1 = scmp.lt.s32.totalorder %s265_s8, %s265_s8 }
   0xd   :  { %276 = vmatpush1.msk.msra.mxu0 %vm33_vm0, %v27_v27  ;;  %p317_p0 = scmp.ne.s32.totalorder %s265_s8, %s316_s2  ;;  %p322_p2 = scmp.lt.s32.totalorder %s316_s2, %s316_s2 }
   0xe   :  { %277 = vmatmul.mubr.msk.f32.vlgmr.msra.gmra.mrb[0].mxu0 %vm29_vm1, %v18_v28 }
   0xf   :  { %289 = vmatpush1.msk.msra.mxu1 %vm33_vm0, %v286_v29  ;;  %p323_p3 = por %p322_p2, %p321_p1 }
  0x10   :  { %290 = vmatmul.mubr.msk.f32.vlgmr.msra.gmra.mrb[0].mxu1 %vm29_vm1, %v18_v28 }
  0x11   :  { %p324_p4 = pnand %p323_p3, %p317_p0 }
  0xe1   :  { %v106_v30 = vpop.f32.mrb[0].mxu0 }
  0xe2   :  { %v108_v31 = vpop.f32.mrb[1].mxu0 }
  0xe3   :  { %v198_v32 = vpop.f32.mrb[0].mxu1  ;;  %v111_v33 = vadd.f32 %v108_v31, %v106_v30 }
  0xe4   :  { %v200_v34 = vpop.f32.mrb[1].mxu1 }
  0xe5   :  { %112 = vadd.xlane.f32.xlu0 %v111_v33  ;;  %v203_v35 = vadd.f32 %v200_v34, %v198_v32 }
  0xe9   :  { %204 = vadd.xlane.f32.xlu0 %v203_v35 }
 0x172   :  { %v113_v36 = vpop.xlane.xlu0 %112 }
 0x176   :  { %v205_v37 = vpop.xlane.xlu0 %204 }
 0x177   :  { %v206_v38 = vadd.f32 %v205_v37, %v113_v36 }
 0x179   :  { %v207_v39 = vmul.f32 0.001953125, %v206_v38 }
 0x17b   :  { %v208_v40 = vsub.f32 %v106_v30, %v207_v39  ;;  %v209_v41 = vsub.f32 %v108_v31, %v207_v39  ;;  %v216_v42 = vsub.f32 %v198_v32, %v207_v39  ;;  %v217_v43 = vsub.f32 %v200_v34, %v207_v39 }
 0x17d   :  { %v210_v44 = vmul.f32 %v208_v40, %v208_v40  ;;  %v211_v45 = vmul.f32 %v209_v41, %v209_v41  ;;  %v218_v46 = vmul.f32 %v216_v42, %v216_v42  ;;  %v219_v47 = vmul.f32 %v217_v43, %v217_v43 }
 0x17f   :  { %v212_v48 = vadd.f32 %v211_v45, %v210_v44  ;;  %v220_v49 = vadd.f32 %v219_v47, %v218_v46 }
 0x181   :  { %213 = vadd.xlane.f32.xlu1 %v212_v48 }
 0x185   :  { %221 = vadd.xlane.f32.xlu1 %v220_v49 }
 0x20e   :  { %v214_v51 = vpop.xlane.xlu1 %213 }
 0x212   :  { %v222_v52 = vpop.xlane.xlu1 %221 }
 0x213   :  { %v223_v53 = vadd.f32 %v222_v52, %v214_v51 }
 0x215   :  { %v224_v54 = vmul.f32 0.001953125, %v223_v53 }
 0x217   :  { %v226_v55 = vadd.f32 1e-05, %v224_v54 }
 0x219   :  { %314 = vrsqrt.f32 %v226_v55 }
 0x223   :  { %v315_v57 = vpop.eup %314 }
 0x224   :  { %v228_v58 = vmul.f32 %v315_v57, %v225_v56 }
 0x226   :  { %234 = vperm.xlu0 %312, %v228_v58   ;;  %v230_v60 = vmul.f32 %v228_v58, %v207_v39 }
 0x228   :  { %v231_v61 = vsub.f32 %v229_v59, %v230_v60 }
 0x22a   :  { %241 = vperm.xlu1 %313, %v231_v61  }
 0x2a5   :  { %v235_v62 = vpop.permute.xlu0 %234 }
 0x2a6   :  { %v237_v63 = vmul.f32 %v235_v62, %v106_v30  ;;  %v238_v0 = vmul.f32 %v235_v62, %v108_v31  ;;  %v250_v1 = vmul.f32 %v235_v62, %v198_v32  ;;  %v251_v2 = vmul.f32 %v235_v62, %v200_v34 }
 0x2a9   :  { %v242_v3 = vpop.permute.xlu1 %241 }
 0x2aa   :  { %v244_v4 = vadd.f32 %v242_v3, %v237_v63  ;;  %v245_v5 = vadd.f32 %v242_v3, %v238_v0  ;;  %v252_v6 = vadd.f32 %v250_v1, %v242_v3  ;;  %v253_v7 = vadd.f32 %v251_v2, %v242_v3 }
 0x2ac   :  { %v246_v8 = vmax.f32 %v244_v4, 0.0  ;;  %v247_v9 = vmax.f32 %v245_v5, 0.0  ;;  %v254_v10 = vmax.f32 %v252_v6, 0.0  ;;  %v255_v11 = vmax.f32 %v253_v7, 0.0 }
 0x2ae   :  { %248 = vst [vmem:[#allocation2] sm:$0xff] %v246_v8  ;;  %249 = vst [vmem:[#allocation2 + $0x8] sm:$0xff] %v247_v9 }
 0x2af   :  { %257 = vst [vmem:[#allocation2 + $0x10] sm:$0xff] %v254_v10  ;;  %258 = vst [vmem:[#allocation2 + $0x18] sm:$0xff] %v255_v11 }
 0x2b0   :  { %327 = shalt.err (!%p324_p4)
}
 0x2b1   :  { %s328_s10 = scalar_lea.hbm %s455_s4, 512 }
 0x2b2   :  { %p329_p5 = scmp.ne.s32.totalorder %s455_s4, %s328_s10  ;;  %p332_p6 = scmp.lt.u32.totalorder %s328_s10, %s455_s4 }
 0x2b4   :  { %p334_p7 = pnand %p332_p6, %p329_p5 }
 0x2b6   :  { %337 = shalt.err (!%p334_p7)
}
 0x2b7   :  { %s343_s15 = smov 256   ;;  %s344_s16 = smov 16  }
 0x2b8   :  { %270 = dma.vmem_to_hbm [thread:$0]  %s265_s8, 512, %s455_s4, [#allocation3], %s343_s15, %s343_s15, %s344_s16  }
 0x2b9   :  { %338 = dma.done.wait [#allocation3], 512  }
 0x2ba   :  { %339 = vsyncadd [#allocation3], 4294966784 }
 0x2bb   :  { %274 = vsyncpa [#allocation3], 1 }

</bundles_post_ra>
